<compile_context>
chip_gen: v7x
topology: tpu7x:2x2x1
jax: 0.10.0
libtpu: 0.0.40
codegen_flags: <defaults>
</compile_context>

<pallas_src>
import math
from functools import partial

import jax
import jax.numpy as jnp
from jax.experimental import pallas as pl
from jax.experimental.pallas import tpu as pltpu

# ----------------------------- small test config ------------------------------
BATCH = 2          # B
DIM = 32           # C (channels)
SEQ = 16           # T (time steps)
KERNEL_SIZE = 5    # conv kernel size (odd -> symmetric 'same' padding)
GROUPS = 4         # grouped conv
EPS = 1e-5         # nn.LayerNorm default
T_TILE = 8         # time rows per grid step (multiple of 8; 512-1024 at prod dims)


# ------------------------------- Pallas kernel --------------------------------
def pos_encoder_kernel(x_ref, w_ref, vec_ref, out_ref, *, t_tile, K, eps):
    """Grid = (B, T // t_tile).

    x_ref  : (T + K - 1, C) f32  padded, channel-last rows of this batch
                                 (block index constant along the time-tile axis
                                 -> DMA'd once per batch, then revisited)
    w_ref  : (K, C, C)      bf16 dense block-diagonal tap matrices (in, out)
    vec_ref: (3, C)         f32  [conv bias ; LN gamma ; LN beta]
    out_ref: (t_tile, C)    f32  output rows of this (batch, time-tile)
    """
    C = out_ref.shape[-1]
    base = pl.multiple_of(pl.program_id(1) * t_tile, t_tile)

    # One aligned dynamic load of the halo'd window, then K static sub-views:
    # no per-tap concat / roll / mask.
    halo = x_ref[pl.ds(base, t_tile + K - 1), :]              # (t_tile+K-1, C) f32

    acc = jnp.zeros((t_tile, C), jnp.float32)
    for dt in range(K):                                       # static unroll (K small)
        win = halo[dt:dt + t_tile, :].astype(jnp.bfloat16)    # (t_tile, C)
        acc += jnp.dot(win, w_ref[dt],                        # bf16 MXU, f32 acc
                       preferred_element_type=jnp.float32)

    y = acc + vec_ref[0:1, :]                                 # conv bias (f32)

    # LayerNorm over the channel dim (module normalizes after transpose(1,2));
    # single-pass statistics.
    mu = jnp.mean(y, axis=-1, keepdims=True)
    ms = jnp.mean(y * y, axis=-1, keepdims=True)
    y = (y - mu) * jax.lax.rsqrt(ms - mu * mu + eps)
    y = y * vec_ref[1:2, :] + vec_ref[2:3, :]

    # exact-erf GELU (PyTorch nn.GELU default); elementwise, so layout-agnostic.
    out_ref[...] = 0.5 * y * (1.0 + jax.lax.erf(y * (1.0 / math.sqrt(2.0))))


# --------------------------------- wrapper -------------------------------------
def wav2vec2_pos_encoder_layer(x_bct, weight, bias, gamma, beta, *, groups,
                               eps=EPS, t_tile=None):
    """x_bct : (B, C, T)   weight: (C, C//groups, K)   bias/gamma/beta: (C,)"""
    B, C, T = x_bct.shape
    K = weight.shape[-1]
    left = (K - 1) // 2                        # PyTorch padding='same' split (odd K)
    right = K - 1 - left
    cg = C // groups

    if t_tile is None:
        t_tile = T
    assert T % t_tile == 0 and (t_tile % 8 == 0 or t_tile == T)
    nt = T // t_tile

    # Dense (C_in, C_out) tap matrices, block-diagonal over groups, bf16.
    # One-time weight re-layout ("load time"); dense kept since C/groups < 128.
    w_taps = jnp.zeros((K, C, C), jnp.float32)
    for g in range(groups):
        blk = jnp.transpose(weight[g * cg:(g + 1) * cg], (2, 1, 0))   # (K, cg_in, cg_out)
        w_taps = w_taps.at[:, g * cg:(g + 1) * cg, g * cg:(g + 1) * cg].set(blk)
    w_taps = w_taps.astype(jnp.bfloat16)

    # pack the three per-channel vectors into a single resident DMA
    vecs = jnp.stack([bias, gamma, beta], axis=0).astype(jnp.float32)  # (3, C)

    # channel-last + 'same' zero padding along time (layout plumbing, done once)
    x_tlc = jnp.transpose(x_bct, (0, 2, 1)).astype(jnp.float32)        # (B, T, C)
    x_pad = jnp.pad(x_tlc, ((0, 0), (left, right), (0, 0)))            # (B, T+K-1, C)
    t_pad = T + K - 1

    kernel = partial(pos_encoder_kernel, t_tile=t_tile, K=K, eps=eps)
    y = pl.pallas_call(
        kernel,
        out_shape=jax.ShapeDtypeStruct((B, T, C), jnp.float32),
        grid=(B, nt),
        in_specs=[
            # padded activations: index depends only on the batch axis
            pl.BlockSpec((None, t_pad, C), lambda b, t: (b, 0, 0)),
            # weights / vectors: constant index -> resident for the whole grid
            pl.BlockSpec((K, C, C), lambda b, t: (0, 0, 0)),
            pl.BlockSpec((3, C), lambda b, t: (0, 0)),
        ],
        out_specs=pl.BlockSpec((None, t_tile, C), lambda b, t: (b, t, 0)),
        compiler_params=pltpu.CompilerParams(
            # batch axis is independent -> megacore sharding on v7x
            dimension_semantics=("parallel", "arbitrary"),
            # explicit (generous) budget; actual footprint here is a few KiB
            vmem_limit_bytes=16 * 1024 * 1024,
        ),
    )(x_pad, w_taps, vecs)

    # back to the module's (B, C, T) layout
    return jnp.transpose(y, (0, 2, 1))


# ----------------------------- pure-JAX reference -------------------------------
def reference_forward(x_bct, weight, bias, gamma, beta, *, groups, eps=EPS):
    K = weight.shape[-1]
    left = (K - 1) // 2
    right = K - 1 - left
    y = jax.lax.conv_general_dilated(
        x_bct, weight, window_strides=(1,), padding=[(left, right)],
        dimension_numbers=("NCH", "OIH", "NCH"),
        feature_group_count=groups)
    y = y + bias[None, :, None]
    yt = jnp.transpose(y, (0, 2, 1))                      # (B, T, C)
    mu = jnp.mean(yt, axis=-1, keepdims=True)
    var = jnp.mean((yt - mu) ** 2, axis=-1, keepdims=True)
    yt = (yt - mu) * jax.lax.rsqrt(var + eps) * gamma + beta
    y = jnp.transpose(yt, (0, 2, 1))                      # (B, C, T)
    return jax.nn.gelu(y, approximate=False)


# ----------------------------------- main ---------------------------------------
if __name__ == "__main__":
    key = jax.random.PRNGKey(0)
    k1, k2, k3, k4, k5 = jax.random.split(key, 5)

    cg = DIM // GROUPS
    x = jax.random.normal(k1, (BATCH, DIM, SEQ), jnp.float32)
    weight = jax.random.normal(k2, (DIM, cg, KERNEL_SIZE), jnp.float32) * (cg * KERNEL_SIZE) ** -0.5
    bias = jax.random.normal(k3, (DIM,), jnp.float32) * 0.02
    gamma = 1.0 + jax.random.normal(k4, (DIM,), jnp.float32) * 0.05
    beta = jax.random.normal(k5, (DIM,), jnp.float32) * 0.05

    out = wav2vec2_pos_encoder_layer(x, weight, bias, gamma, beta,
                                     groups=GROUPS, t_tile=T_TILE)
    out = jax.block_until_ready(out)

    ref = reference_forward(x, weight, bias, gamma, beta, groups=GROUPS)
    assert out.shape == (BATCH, DIM, SEQ)
    max_err = float(jnp.max(jnp.abs(out - ref)))
    # tolerance relaxed vs the f32 reference because the tap matmuls run in bf16
    assert jnp.allclose(out, ref, rtol=5e-2, atol=5e-2), max_err

    print("KERNEL_OK")
</pallas_src>

<mosaic_0001>
module attributes {stable_mosaic.version = 11 : i64} {
  func.func @pos_encoder_kernel(%arg0: i32, %arg1: i32, %arg2: memref<1x20x32xf32, #tpu.memory_space<vmem>>, %arg3: memref<5x32x32xbf16, #tpu.memory_space<vmem>>, %arg4: memref<3x32xf32, #tpu.memory_space<vmem>>, %arg5: memref<1x8x32xf32, #tpu.memory_space<vmem>>) attributes {dimension_semantics = [#tpu.dimension_semantics<parallel>, #tpu.dimension_semantics<arbitrary>], iteration_bounds = array<i64: 2, 2>, scalar_prefetch = 0 : i64, scratch_operands = 0 : i64, tpu.core_type = #tpu.core_type<tc>, window_params = [{transform_indices = @transform_0, window_bounds = array<i64: 1, 20, 32>}, {pipeline_mode = #tpu.pipeline_mode<synchronous>, transform_indices = @transform_1, window_bounds = array<i64: 5, 32, 32>}, {pipeline_mode = #tpu.pipeline_mode<synchronous>, transform_indices = @transform_2, window_bounds = array<i64: 3, 32>}, {transform_indices = @transform_3, window_bounds = array<i64: 1, 8, 32>}]} {
    %c8_i32 = arith.constant 8 : i32
    %0 = arith.muli %arg1, %c8_i32 : i32
    %1 = tpu.assume_multiple %0, 8 : i32
    %c0 = arith.constant 0 : index
    %2 = arith.index_cast %1 : i32 to index
    %c0_0 = arith.constant 0 : index
    %3 = vector.load %arg2[%c0, %2, %c0_0] : memref<1x20x32xf32, #tpu.memory_space<vmem>>, vector<1x12x32xf32>
    %4 = vector.shape_cast %3 : vector<1x12x32xf32> to vector<12x32xf32>
    %cst = arith.constant 0.000000e+00 : f32
    %5 = vector.broadcast %cst : f32 to vector<8x32xf32>
    %6 = vector.extract_strided_slice %4 {offsets = [0, 0], sizes = [8, 32], strides = [1, 1]} : vector<12x32xf32> to vector<8x32xf32>
    %7 = arith.truncf %6 : vector<8x32xf32> to vector<8x32xbf16>
    %c0_1 = arith.constant 0 : index
    %c0_2 = arith.constant 0 : index
    %c0_3 = arith.constant 0 : index
    %8 = vector.load %arg3[%c0_1, %c0_2, %c0_3] : memref<5x32x32xbf16, #tpu.memory_space<vmem>>, vector<1x32x32xbf16>
    %9 = vector.shape_cast %8 : vector<1x32x32xbf16> to vector<32x32xbf16>
    %cst_4 = arith.constant dense<0.000000e+00> : vector<8x32xf32>
    %10 = tpu.matmul %7, %9, %cst_4 {dimension_numbers = #tpu.dot_dimension_numbers<[1], [0], [0], [1], [0, 0, 1, 1], [], []>} : vector<8x32xbf16>, vector<32x32xbf16>, vector<8x32xf32> -> vector<8x32xf32>
    %11 = arith.addf %5, %10 : vector<8x32xf32>
    %12 = vector.extract_strided_slice %4 {offsets = [1, 0], sizes = [8, 32], strides = [1, 1]} : vector<12x32xf32> to vector<8x32xf32>
    %13 = arith.truncf %12 : vector<8x32xf32> to vector<8x32xbf16>
    %c1 = arith.constant 1 : index
    %c0_5 = arith.constant 0 : index
    %c0_6 = arith.constant 0 : index
    %14 = vector.load %arg3[%c1, %c0_5, %c0_6] : memref<5x32x32xbf16, #tpu.memory_space<vmem>>, vector<1x32x32xbf16>
    %15 = vector.shape_cast %14 : vector<1x32x32xbf16> to vector<32x32xbf16>
    %cst_7 = arith.constant dense<0.000000e+00> : vector<8x32xf32>
    %16 = tpu.matmul %13, %15, %cst_7 {dimension_numbers = #tpu.dot_dimension_numbers<[1], [0], [0], [1], [0, 0, 1, 1], [], []>} : vector<8x32xbf16>, vector<32x32xbf16>, vector<8x32xf32> -> vector<8x32xf32>
    %17 = arith.addf %11, %16 : vector<8x32xf32>
    %18 = vector.extract_strided_slice %4 {offsets = [2, 0], sizes = [8, 32], strides = [1, 1]} : vector<12x32xf32> to vector<8x32xf32>
    %19 = arith.truncf %18 : vector<8x32xf32> to vector<8x32xbf16>
    %c2 = arith.constant 2 : index
    %c0_8 = arith.constant 0 : index
    %c0_9 = arith.constant 0 : index
    %20 = vector.load %arg3[%c2, %c0_8, %c0_9] : memref<5x32x32xbf16, #tpu.memory_space<vmem>>, vector<1x32x32xbf16>
    %21 = vector.shape_cast %20 : vector<1x32x32xbf16> to vector<32x32xbf16>
    %cst_10 = arith.constant dense<0.000000e+00> : vector<8x32xf32>
    %22 = tpu.matmul %19, %21, %cst_10 {dimension_numbers = #tpu.dot_dimension_numbers<[1], [0], [0], [1], [0, 0, 1, 1], [], []>} : vector<8x32xbf16>, vector<32x32xbf16>, vector<8x32xf32> -> vector<8x32xf32>
    %23 = arith.addf %17, %22 : vector<8x32xf32>
    %24 = vector.extract_strided_slice %4 {offsets = [3, 0], sizes = [8, 32], strides = [1, 1]} : vector<12x32xf32> to vector<8x32xf32>
    %25 = arith.truncf %24 : vector<8x32xf32> to vector<8x32xbf16>
    %c3 = arith.constant 3 : index
    %c0_11 = arith.constant 0 : index
    %c0_12 = arith.constant 0 : index
    %26 = vector.load %arg3[%c3, %c0_11, %c0_12] : memref<5x32x32xbf16, #tpu.memory_space<vmem>>, vector<1x32x32xbf16>
    %27 = vector.shape_cast %26 : vector<1x32x32xbf16> to vector<32x32xbf16>
    %cst_13 = arith.constant dense<0.000000e+00> : vector<8x32xf32>
    %28 = tpu.matmul %25, %27, %cst_13 {dimension_numbers = #tpu.dot_dimension_numbers<[1], [0], [0], [1], [0, 0, 1, 1], [], []>} : vector<8x32xbf16>, vector<32x32xbf16>, vector<8x32xf32> -> vector<8x32xf32>
    %29 = arith.addf %23, %28 : vector<8x32xf32>
    %30 = vector.extract_strided_slice %4 {offsets = [4, 0], sizes = [8, 32], strides = [1, 1]} : vector<12x32xf32> to vector<8x32xf32>
    %31 = arith.truncf %30 : vector<8x32xf32> to vector<8x32xbf16>
    %c4 = arith.constant 4 : index
    %c0_14 = arith.constant 0 : index
    %c0_15 = arith.constant 0 : index
    %32 = vector.load %arg3[%c4, %c0_14, %c0_15] : memref<5x32x32xbf16, #tpu.memory_space<vmem>>, vector<1x32x32xbf16>
    %33 = vector.shape_cast %32 : vector<1x32x32xbf16> to vector<32x32xbf16>
    %cst_16 = arith.constant dense<0.000000e+00> : vector<8x32xf32>
    %34 = tpu.matmul %31, %33, %cst_16 {dimension_numbers = #tpu.dot_dimension_numbers<[1], [0], [0], [1], [0, 0, 1, 1], [], []>} : vector<8x32xbf16>, vector<32x32xbf16>, vector<8x32xf32> -> vector<8x32xf32>
    %35 = arith.addf %29, %34 : vector<8x32xf32>
    %c0_17 = arith.constant 0 : index
    %c0_18 = arith.constant 0 : index
    %36 = vector.load %arg4[%c0_17, %c0_18] : memref<3x32xf32, #tpu.memory_space<vmem>>, vector<1x32xf32>
    %37 = vector.broadcast %36 : vector<1x32xf32> to vector<8x32xf32>
    %38 = arith.addf %35, %37 : vector<8x32xf32>
    %cst_19 = arith.constant dense<0.000000e+00> : vector<8xf32>
    %39 = vector.multi_reduction <add>, %38, %cst_19 [1] : vector<8x32xf32> to vector<8xf32>
    %40 = vector.shape_cast %39 : vector<8xf32> to vector<8x1xf32>
    %cst_20 = arith.constant 3.200000e+01 : f32
    %41 = vector.broadcast %cst_20 : f32 to vector<8x1xf32>
    %42 = arith.divf %40, %41 : vector<8x1xf32>
    %43 = arith.mulf %38, %38 : vector<8x32xf32>
    %cst_21 = arith.constant dense<0.000000e+00> : vector<8xf32>
    %44 = vector.multi_reduction <add>, %43, %cst_21 [1] : vector<8x32xf32> to vector<8xf32>
    %45 = vector.shape_cast %44 : vector<8xf32> to vector<8x1xf32>
    %cst_22 = arith.constant 3.200000e+01 : f32
    %46 = vector.broadcast %cst_22 : f32 to vector<8x1xf32>
    %47 = arith.divf %45, %46 : vector<8x1xf32>
    %48 = vector.broadcast %42 : vector<8x1xf32> to vector<8x32xf32>
    %49 = arith.subf %38, %48 : vector<8x32xf32>
    %50 = arith.mulf %42, %42 : vector<8x1xf32>
    %51 = arith.subf %47, %50 : vector<8x1xf32>
    %cst_23 = arith.constant 9.99999974E-6 : f32
    %52 = vector.broadcast %cst_23 : f32 to vector<8x1xf32>
    %53 = arith.addf %51, %52 : vector<8x1xf32>
    %54 = math.rsqrt %53 : vector<8x1xf32>
    %55 = vector.broadcast %54 : vector<8x1xf32> to vector<8x32xf32>
    %56 = arith.mulf %49, %55 : vector<8x32xf32>
    %c1_24 = arith.constant 1 : index
    %c0_25 = arith.constant 0 : index
    %57 = vector.load %arg4[%c1_24, %c0_25] : memref<3x32xf32, #tpu.memory_space<vmem>>, vector<1x32xf32>
    %58 = vector.broadcast %57 : vector<1x32xf32> to vector<8x32xf32>
    %59 = arith.mulf %56, %58 : vector<8x32xf32>
    %c2_26 = arith.constant 2 : index
    %c0_27 = arith.constant 0 : index
    %60 = vector.load %arg4[%c2_26, %c0_27] : memref<3x32xf32, #tpu.memory_space<vmem>>, vector<1x32xf32>
    %61 = vector.broadcast %60 : vector<1x32xf32> to vector<8x32xf32>
    %62 = arith.addf %59, %61 : vector<8x32xf32>
    %cst_28 = arith.constant 5.000000e-01 : f32
    %63 = vector.broadcast %cst_28 : f32 to vector<8x32xf32>
    %64 = arith.mulf %63, %62 : vector<8x32xf32>
    %cst_29 = arith.constant 0.707106769 : f32
    %65 = vector.broadcast %cst_29 : f32 to vector<8x32xf32>
    %66 = arith.mulf %62, %65 : vector<8x32xf32>
    %67 = math.erf %66 : vector<8x32xf32>
    %cst_30 = arith.constant 1.000000e+00 : f32
    %68 = vector.broadcast %cst_30 : f32 to vector<8x32xf32>
    %69 = arith.addf %68, %67 : vector<8x32xf32>
    %70 = arith.mulf %64, %69 : vector<8x32xf32>
    %c0_31 = arith.constant 0 : index
    %c0_32 = arith.constant 0 : index
    %c0_33 = arith.constant 0 : index
    %71 = vector.load %arg5[%c0_31, %c0_32, %c0_33] : memref<1x8x32xf32, #tpu.memory_space<vmem>>, vector<1x8x32xf32>
    %72 = vector.shape_cast %71 : vector<1x8x32xf32> to vector<8x32xf32>
    %73 = vector.shape_cast %70 : vector<8x32xf32> to vector<1x8x32xf32>
    tpu.vector_store %arg5[%c0_31, %c0_32, %c0_33], %73 {strides = array<i32>} : memref<1x8x32xf32, #tpu.memory_space<vmem>>, vector<1x8x32xf32>,
    return
  }
  func.func @transform_0(%arg0: i32, %arg1: i32) -> (i32, i32, i32) {
    %c0_i32 = arith.constant 0 : i32
    %c0_i32_0 = arith.constant 0 : i32
    %c0_i32_1 = arith.constant 0 : i32
    return %arg0, %c0_i32, %c0_i32_0 : i32, i32, i32
  }
  func.func @transform_1(%arg0: i32, %arg1: i32) -> (i32, i32, i32) {
    %c0_i32 = arith.constant 0 : i32
    %c0_i32_0 = arith.constant 0 : i32
    %c0_i32_1 = arith.constant 0 : i32
    %c0_i32_2 = arith.constant 0 : i32
    return %c0_i32, %c0_i32_0, %c0_i32_1 : i32, i32, i32
  }
  func.func @transform_2(%arg0: i32, %arg1: i32) -> (i32, i32) {
    %c0_i32 = arith.constant 0 : i32
    %c0_i32_0 = arith.constant 0 : i32
    %c0_i32_1 = arith.constant 0 : i32
    return %c0_i32, %c0_i32_0 : i32, i32
  }
  func.func @transform_3(%arg0: i32, %arg1: i32) -> (i32, i32, i32) {
    %c0_i32 = arith.constant 0 : i32
    %c0_i32_0 = arith.constant 0 : i32
    return %arg0, %arg1, %c0_i32 : i32, i32, i32
  }
}

</mosaic_0001>

<bundles_post_ra>
// kernel: tpu_custom_call.1
= control target key start
LH: loop header
LB: loop body
LE: loop exit
PB: predicated region body
PF: predicated region fallthrough
CT: control target
= control target key end

     0   :  { %8 = vsyncpa [#allocation3], 0  ;;  %s1133_s0 = inlined_call_operand.vmem [shape: f32[2,20,32], index: 0, kind: input, shape index: {}]   ;;  %s1134_s1 = inlined_call_operand.vmem [shape: bf16[5,32,32], index: 1, kind: input, shape index: {}]   ;;  %s1135_s2 = inlined_call_operand.vmem [shape: f32[3,32], index: 2, kind: input, shape index: {}]   ;;  %s1136_s3 = inlined_call_operand.hbm [shape: f32[2,16,32], index: 3, kind: output, shape index: {}]  }
   0x1   :  { %10 = vsyncpa [#allocation3 + $0x1], 0  ;;  %s945_s12 = smov 0   ;;  %s947_s13 = smov 0  }
   0x2   :  { %s949_s14 = smov 0   ;;  %s951_s15 = smov 0  }
   0x3   :  { %s953_s16 = smov 0   ;;  %s955_s17 = smov 0  }
   0x4   :  { %s957_s18 = smov 0   ;;  %s959_s19 = smov 0  }
   0x5 LB: > { %s636_s20 = sadd.s32 4294967295, %s920_s19   ;;  %s637_s21 = sadd.s32 4294967294, %s920_s19   ;;  %s920_s19 = sphi %s959_s19, %s16_s19   ;;  %s916_s18 = sphi %s957_s18, %s1145_s18   ;;  %s912_s17 = sphi %s955_s17, %s1144_s17   ;;  %s908_s16 = sphi %s953_s16, %s1143_s16   ;;  %s904_s15 = sphi %s951_s15, %s1142_s15   ;;  %s900_s14 = sphi %s949_s14, %s1141_s14   ;;  %s896_s13 = sphi %s947_s13, %s1140_s13   ;;  %s892_s12 = sphi %s945_s12, %s1139_s12  }
   0x6   : > { %s25_s22 = sadd.s32 1, %s912_s17  ;;  %s28_s23 = sadd.s32 1, %s916_s18 }
   0x7   : > { %p26_p0 = scmp.ge.s32.totalorder %s25_s22, 2  ;;  %p115_p1 = scmp.ne.s32.totalorder %s900_s14, %s896_s13 }
   0x8   : > { %p116_p2 = scmp.eq.s32.totalorder %s636_s20, 3  ;;  %p121_p5 = scmp.ne.s32.totalorder %s896_s13, %s892_s12 }
   0x9   : > { %s1147_s22 = smov (%p26_p0, %s25_s22), 0  ;;  %s1149_s23 = smov (!%p26_p0, %s28_s23), %s916_s18 }
   0xa   : > { %s101_s24 = ssub.s32 %s912_s17, %s1147_s22  ;;  %p996_p3 = por %p116_p2, %p115_p1 }
   0xb   : > { %p30_p4 = scmp.ge.s32.totalorder %s1149_s23, 2  ;;  %p122_p6 = scmp.eq.s32.totalorder %s637_s21, 3 }
   0xc   : > { %p640_p7 = scmp.ge.s32.totalorder %s920_s19, 1  ;;  %p154_p9 = scmp.lt.s32.totalorder %s920_s19, 5 }
   0xd   : > { %s1151_s23 = smov (%p30_p4, %s1149_s23), 0  ;;  %p1005_p8 = por %p122_p6, %p121_p5 }
   0xe   : > { %s100_s27 = ssub.s32 %s916_s18, %s1151_s23  ;;  %s105_s28 = sadd.s32 1, %s900_s14 }
   0xf   : > { %s102_s29 = sor.u32 %s101_s24, %s100_s27  ;;  %p155_p10 = pnand %p640_p7, %p154_p9 }
  0x10   : > { %p103_p11 = scmp.eq.s32.totalorder %s102_s29, 0  ;;  %v812_v0 = vld [vmem:[%s1134_s1 + $0x10] sm:$0xff] (!%p155_p10)   ;;  %v922_v1 = vmov (!%p155_p10), 0.0   ;;  %v813_v2 = vld [vmem:[%s1134_s1] sm:$0xff] (!%p155_p10)   ;;  %v814_v3 = vld [vmem:[%s1134_s1 + $0x18] sm:$0xff] (!%p155_p10)   ;;  %vm923_vm0 = vmmov (!%p155_p10), 0  }
  0x11   : > { %158 = sbr.rel (%p155_p10) target bundleno = 472 (0x1d8), region = 32  ;;  %698 = vmatprep.subr.bf16.mxu0 (!%p155_p10), %v922_v1  ;;  %706 = vmatprep.subr.bf16.mxu1 (!%p155_p10), %v922_v1  ;;  %p178_p12 = scmp.lt.s32.totalorder (!%p155_p10), %s908_s16, 1  ;;  %v815_v4 = vld [vmem:[%s1134_s1 + $0x8] sm:$0xff] (!%p155_p10)   ;;  %vm218_vm1 = vcmask (!%p155_p10), 261120   ;;  %v817_v7 = vld [vmem:[%s1134_s1 + $0x30] sm:$0xff] (!%p155_p10)   ;;  %v819_v12 = vld [vmem:[%s1134_s1 + $0x38] sm:$0xff] (!%p155_p10)  }
  0x12   : > { %s1014_s30 = scalar_select %p103_p11, %s900_s14, %s105_s28  }
  0x13   : > { %699 = vmatpush3.bf16.msra.mxu0 (!%p155_p10), %v812_v0  ;;  %702 = vmatprep.mubr.msk.bf16.mxu0 (!%p155_p10), %vm923_vm0, %v922_v1  ;;  %s643_s24 = sshll.u32 (!%p155_p10), %s904_s15, 3  ;;  %v816_v16 = vld [vmem:[%s1134_s1 + $0x20] sm:$0xff] (!%p155_p10)   ;;  %v818_v19 = vld [vmem:[%s1134_s1 + $0x28] sm:$0xff] (!%p155_p10)   ;;  %s175_s9 = sand.u32 (!%p155_p10), 1, %s896_s13  }
  0x14   : > { %707 = vmatpush3.bf16.msra.mxu1 (!%p155_p10), %v813_v2  ;;  %700 = vmatprep.subr.bf16.mxu0 (!%p155_p10), %v922_v1  ;;  %v820_v21 = vld [vmem:[%s1134_s1 + $0x40] sm:$0xff] (!%p155_p10)   ;;  %v821_v22 = vld [vmem:[%s1134_s1 + $0x48] sm:$0xff] (!%p155_p10)   ;;  %s641_s10 = sshll.u32 (!%p155_p10), %s175_s9, 3  ;;  %s679_s11 = sshll.u32 (!%p155_p10), %s908_s16, 1 }
  0x15   : > { %708 = vmatprep.subr.bf16.mxu1 (!%p155_p10), %v922_v1  ;;  %710 = vmatprep.mubr.msk.bf16.mxu1 (!%p155_p10), %vm923_vm0, %v922_v1  ;;  %v675_v44 = vld [vmem:[%s1135_s2] ss:$0 sm:$0xff] (!%p155_p10)  ;;  %v676_v62 = vld [vmem:[%s1135_s2 + $0x1] ss:$0 sm:$0xff] (!%p155_p10)  ;;  %v677_v0 = vld [vmem:[%s1135_s2 + $0x2] ss:$0 sm:$0xff] (!%p155_p10) }
  0x16   : > { %s924_s5 = smov (!%p155_p10), [#allocation2]  }
  0x17   : > { %701 = vmatpush3.bf16.msra.mxu0 (!%p155_p10), %v814_v3  ;;  %s830_s6 = sshll.u32 (!%p155_p10), %s924_s5, 4  ;;  %s831_s6 = int_to_ptr.vmem [resolvable:$false] %s830_s6 }
  0x18   : > { %s179_s20 = scalar_select %p178_p12, %s908_s16, 1  ;;  %709 = vmatpush3.bf16.msra.mxu1 %v815_v4  ;;  %714 = vmatprep.subr.bf16.mxu0 %v922_v1 }
  0x19   : > { %722 = vmatprep.subr.bf16.mxu1 %v922_v1  ;;  %s832_s7 = scalar_lea.vmem %s831_s6, 256 }
  0x1a   : > { %s738_s21 = smul.u32 24, %s179_s20  ;;  %s558_s20 = sadd.s32 %s904_s15, %s679_s11 }
  0x1b   : > { %s547_s15 = scalar_lea.sflag [#allocation3], %s175_s9 }
  0x1c   : > { %s182_s29 = scalar_lea.vmem %s1133_s0, %s738_s21  ;;  %s680_s21 = sshll.u32 %s558_s20, 7 }
  0x1d   : > { %s185_s4 = scalar_lea.vmem %s182_s29, %s643_s24  ;;  %s177_s24 = scalar_lea.vmem [#allocation2], %s641_s10 }
  0x1e   : > { %v186_v5 = vld [vmem:[%s185_s4] sm:$0xff]  ;;  %v187_v6 = vld [vmem:[%s185_s4 + $0x8] sm:$0xf]  ;;  %s562_s27 = sshll.u32 %s177_s24, 4  ;;  %s1079_s4 = scalar_lea.hbm %s1136_s3, %s680_s21  ;;  %s1081_s27 = int_to_ptr.vmem [resolvable:$true] %s562_s27 }
  0x1f   : > { %v193_v8 = vpack.c.bf16 %v187_v6, %v186_v5  ;;  %v188_v9 = vpack.c.bf16 %v186_v5, %v186_v5  ;;  %s826_s16 = scalar_lea.vmem %s1081_s27, 128  ;;  %p833_p2 = scmp.lt.s32.totalorder %s1081_s27, %s831_s6 }
  0x20   : > { %p827_p13 = scmp.ne.s32.totalorder %s1081_s27, %s826_s16  ;;  %p834_p4 = scmp.lt.s32.totalorder %s832_s7, %s826_s16 }
  0x21   : > { %v200_v10 = vshrl.u32 %v193_v8, 16  ;;  %v202_v11 = vshll.u32 %v193_v8, 16  ;;  %711 = vmatmul.mubr.msk.bf16.vlgmr.msra.gmra.mrb[0].mxu1 %vm218_vm1, %v188_v9  ;;  %v323_v20 = vrot.slane %v193_v8, 1  ;;  %v449_v23 = vrot.slane %v193_v8, 2 }
  0x22   : > { %723 = vmatpush3.bf16.msra.mxu1 %v817_v7  ;;  %726 = vmatprep.mubr.msk.bf16.mxu1 %vm923_vm0, %v922_v1  ;;  %p828_p0 = pnand %p827_p13, %p996_p3  ;;  %p835_p5 = por %p834_p4, %p833_p2 }
  0x23   : > { %v204_v13 = vrot.slane %v202_v11, 1  ;;  %v385_v14 = vrot.slane %v200_v10, 1  ;;  %v386_v15 = vrot.slane %v202_v11, 2  ;;  %724 = vmatprep.subr.bf16.mxu1 %v922_v1 }
  0x24   : > { %p829_p1 = pneg %p828_p0 }
  0x25   : > { %v205_v17 = vor.u32 %v204_v13, %v200_v10  ;;  %v387_v18 = vor.u32 %v386_v15, %v385_v14 }
  0x26   : > { %725 = vmatpush3.bf16.msra.mxu1 %v819_v12  ;;  %p836_p6 = pnand %p835_p5, %p829_p1 }
  0x27   : > { %703 = vmatmul.mubr.msk.bf16.vlgmr.msra.gmra.mrb[0].mxu0 %vm218_vm1, %v205_v17 }
  0x28   : > { %715 = vmatpush3.bf16.msra.mxu0 %v816_v16  ;;  %718 = vmatprep.mubr.msk.bf16.mxu0 %vm923_vm0, %v922_v1 }
  0x29   : > { %716 = vmatprep.subr.bf16.mxu0 %v922_v1  ;;  %727 = vmatmul.mubr.msk.bf16.vlgmr.msra.gmra.mrb[4].mxu1 %vm218_vm1, %v387_v18 }
  0x2c   : > { %717 = vmatpush3.bf16.msra.mxu0 %v818_v19 }
  0x2d   : > { %730 = vmatprep.subr.bf16.mxu0 %v922_v1 }
  0x2f   : > { %719 = vmatmul.mubr.msk.bf16.vlgmr.msra.gmra.mrb[4].mxu0 %vm218_vm1, %v323_v20 }
  0x30   : > { %731 = vmatpush3.bf16.msra.mxu0 %v820_v21  ;;  %734 = vmatprep.mubr.msk.bf16.mxu0 %vm923_vm0, %v922_v1 }
  0x31   : > { %732 = vmatprep.subr.bf16.mxu0 %v922_v1 }
  0x34   : > { %733 = vmatpush3.bf16.msra.mxu0 %v821_v22 }
  0x37   : > { %735 = vmatmul.mubr.msk.bf16.vlgmr.msra.gmra.mrb[8].mxu0 %vm218_vm1, %v449_v23 }
  0xf4   : > { %v311_v24 = vpop.f32.mrb[0].mxu1 }
  0xf5   : > { %v712_v25 = vpop.f32.mrb[1].mxu1 }
  0xf6   : > { %v314_v26 = vpop.f32.mrb[2].mxu1 }
  0xf7   : > { %v713_v27 = vpop.f32.mrb[3].mxu1 }
  0xfa   : > { %v256_v28 = vpop.f32.mrb[0].mxu0 }
  0xfb   : > { %v312_v29 = vadd.f32 %v311_v24, %v256_v28  ;;  %v704_v30 = vpop.f32.mrb[1].mxu0 }
  0xfc   : > { %v259_v31 = vpop.f32.mrb[2].mxu0  ;;  %v437_v32 = vpop.f32.mrb[4].mxu1 }
  0xfd   : > { %v705_v33 = vpop.f32.mrb[3].mxu0  ;;  %v728_v34 = vpop.f32.mrb[5].mxu1 }
  0xfe   : > { %v440_v35 = vpop.f32.mrb[6].mxu1 }
  0xff   : > { %v729_v36 = vpop.f32.mrb[7].mxu1 }
 0x102   : > { %v373_v37 = vpop.f32.mrb[4].mxu0 }
 0x103   : > { %v379_v38 = vadd.f32 %v373_v37, %v312_v29  ;;  %v720_v39 = vpop.f32.mrb[5].mxu0 }
 0x104   : > { %v376_v40 = vpop.f32.mrb[6].mxu0 }
 0x105   : > { %v443_v41 = vadd.f32 %v437_v32, %v379_v38  ;;  %v721_v42 = vpop.f32.mrb[7].mxu0 }
 0x10a   : > { %v499_v43 = vpop.f32.mrb[8].mxu0 }
 0x10b   : > { %v505_v45 = vadd.f32 %v499_v43, %v443_v41  ;;  %v736_v46 = vpop.f32.mrb[9].mxu0 }
 0x10c   : > { %v502_v47 = vpop.f32.mrb[10].mxu0 }
 0x10d   : > { %v511_v48 = vadd.f32 %v675_v44, %v505_v45  ;;  %v737_v49 = vpop.f32.mrb[11].mxu0 }
 0x10f   : > { %v512_v50 = vsel %vm218_vm1, %v511_v48, 0.0  ;;  %v517_v51 = vmul.f32 %v511_v48, %v511_v48 }
 0x110   : > { %513 = vadd.xlane.f32.xlu0 %v512_v50 }
 0x111   : > { %v518_v52 = vsel %vm218_vm1, %v517_v51, 0.0 }
 0x114   : > { %519 = vadd.xlane.f32.xlu0 %v518_v52 }
 0x19d   : > { %v514_v53 = vpop.xlane.xlu0 %513 }
 0x19e   : > { %v516_v54 = vmul.f32 0.03125, %v514_v53 }
 0x1a0   : > { %v523_v56 = vmul.f32 %v516_v54, %v516_v54  ;;  %v522_v60 = vsub.f32 %v511_v48, %v516_v54 }
 0x1a1   : > { %v520_v55 = vpop.xlane.xlu0 %519 }
 0x1a2   : > { %v521_v57 = vmul.f32 0.03125, %v520_v55 }
 0x1a4   : > { %v524_v58 = vsub.f32 %v521_v57, %v523_v56 }
 0x1a6   : > { %v525_v59 = vadd.f32 1e-05, %v524_v58 }
 0x1a8   : > { %822 = vrsqrt.f32 %v525_v59 }
 0x1b2   : > { %v823_v61 = vpop.eup %822 }
 0x1b3   : > { %v527_v63 = vmul.f32 %v823_v61, %v522_v60 }
 0x1b5   : > { %v533_v1 = vmul.f32 %v676_v62, %v527_v63 }
 0x1b7   : > { %v539_v2 = vadd.f32 %v677_v0, %v533_v1 }
 0x1b9   : > { %v541_v3 = vmul.f32 0.70710677, %v539_v2  ;;  %v540_v5 = vmul.f32 0.5, %v539_v2 }
 0x1bb   : > { %824 = verf.f32 %v541_v3 }
 0x1c5   : > { %v825_v4 = vpop.eup %824 }
 0x1c6   : > { %v543_v6 = vadd.f32 1.0, %v825_v4 }
 0x1c8   : > { %v544_v7 = vmul.f32 %v543_v6, %v540_v5 }
 0x1ca   : > { %545 = vst.msk [vmem:[%s177_s24] sm:$0xff] %vm218_vm1, %v544_v7 }
 0x1cb   : > { %839 = shalt.err (!%p836_p6)
}
 0x1cc   : > { %s840_s8 = scalar_lea.hbm %s1079_s4, 128  ;;  %s844_s11 = scalar_lea.hbm %s1136_s3, 512 }
 0x1cd   : > { %p841_p7 = scmp.ne.s32.totalorder %s1079_s4, %s840_s8  ;;  %p845_p11 = scmp.lt.u32.totalorder %s1079_s4, %s1136_s3 }
 0x1ce   : > { %p846_p12 = scmp.lt.u32.totalorder %s844_s11, %s840_s8  ;;  %p848_p0 = scmp.lt.u32.totalorder %s840_s8, %s1079_s4 }
 0x1cf   : > { %p842_p9 = pnand %p841_p7, %p996_p3 }
 0x1d0   : > { %p847_p13 = por %p846_p12, %p845_p11 }
 0x1d1   : > { %p843_p10 = pneg %p842_p9 }
 0x1d2   : > { %p849_p1 = por %p848_p0, %p847_p13 }
 0x1d4   : > { %p850_p2 = pnand %p849_p1, %p843_p10 }
 0x1d6   : > { %853 = shalt.err (!%p850_p2)
}
 0x1d7   : > { %739 = dma.vmem_to_hbm [thread:$0]  (%p996_p3), %s1081_s27, 128, %s1079_s4, %s547_s15  }
 0x1d8 PF: > { %p745_p4 = scmp.ge.s32.totalorder %s920_s19, 2  ;;  %s574_s24 = sand.u32 1, %s892_s12  }
 0x1d9   : > { %s575_s28 = scalar_lea.sflag [#allocation3], %s574_s24 }
 0x1da   : > { %p742_p5 = pnand %p745_p4, %p1005_p8 }
 0x1dc   : > { %887 = dma.done.wait (!%p742_p5), %s575_s28, 128  }
 0x1dd   : > { %889 = vsyncadd (!%p742_p5), %s575_s28, 4294967168  ;;  %s16_s19 = sadd.s32 1, %s920_s19   ;;  %s1139_s12 = smov %s896_s13 }
 0x1de   : > { %p13_p6 = scmp.ge.s32.totalorder %s16_s19, 6   ;;  %s1140_s13 = smov %s900_s14 }
 0x1df   : > { %s1141_s14 = smov %s1014_s30  ;;  %s1142_s15 = smov %s912_s17 }
 0x1e0   : > { %s1143_s16 = smov %s916_s18  ;;  %s1144_s17 = smov %s1147_s22 }
 0x1e1   : > { %s1145_s18 = smov %s1151_s23  ;;  %15 = sbr.rel (!%p13_p6) target bundleno = 5 (0x5), region = 72 }
 0x1e8   :  { %580 = vsyncpa [#allocation3], 1 }
 0x1e9   :  { %582 = vsyncpa [#allocation3 + $0x1], 1 }

</bundles_post_ra>
